<compile_context>
chip_gen: v6e
topology: v6e:2x2x1
jax: 0.10.0
libtpu: 0.0.40
codegen_flags: <defaults>
</compile_context>

<pallas_src>
import functools

import jax
import jax.numpy as jnp
from jax import lax
from jax.experimental import pallas as pl
from jax.experimental.pallas import tpu as pltpu


# ----------------------------------------------------------------------------
# Kernels
# ----------------------------------------------------------------------------
def _lmhead_full_k_kernel(x_ref, w_ref, b_ref, o_ref):
    # Single-shot tile: x (tm, K) @ w (tn, K)^T -> (tm, tn), f32 accumulation.
    # trans-B contraction (K is the last dim of both) lowers to the native
    # transposed-weight MXU push; no per-tile XLU transpose.
    acc = lax.dot_general(
        x_ref[...],
        w_ref[...],
        dimension_numbers=(((1,), (1,)), ((), ())),  # contract on K (trans-B)
        preferred_element_type=jnp.float32,
    )
    o_ref[...] = (acc + b_ref[...].astype(jnp.float32)).astype(o_ref.dtype)


def _lmhead_reduce_kernel(x_ref, w_ref, b_ref, o_ref, acc_ref):
    # grid = (N//tn, M//tm, K//tk); K is the last ("arbitrary") reduction axis.
    k = pl.program_id(2)

    @pl.when(k == 0)
    def _():
        acc_ref[...] = jnp.zeros_like(acc_ref)

    acc_ref[...] += lax.dot_general(
        x_ref[...],
        w_ref[...],
        dimension_numbers=(((1,), (1,)), ((), ())),  # contract on K (trans-B)
        preferred_element_type=jnp.float32,
    )

    @pl.when(k == pl.num_programs(2) - 1)
    def _():
        # b_ref is (1, tn) -> broadcasts over the tm rows of the tile.
        o_ref[...] = (acc_ref[...] + b_ref[...].astype(jnp.float32)).astype(
            o_ref.dtype
        )


# ----------------------------------------------------------------------------
# Helpers
# ----------------------------------------------------------------------------
def _round_up(a: int, b: int) -> int:
    return (a + b - 1) // b * b


@functools.lru_cache(maxsize=1)
def _vmem_limit_cap() -> int:
    """Generation-aware scoped-VMEM cap (~80% of physical, <= 100 MiB)."""
    try:
        cap = int(pltpu.get_tpu_info().vmem_capacity_bytes)
    except Exception:
        cap = 64 * 1024 * 1024  # conservative (v7x-sized) fallback
    return max(min(int(cap * 0.80), 100 * 1024 * 1024), 8 * 1024 * 1024)


# Square tile targets (all multiples of 128), largest-first.
_SQUARE_TILE_TARGETS = (2048, 1792, 1536, 1280, 1024, 896, 768, 640, 512, 384, 256, 128)
# K-step targets for the reduction fallback, largest-first.
_TK_TARGETS = (2048, 1536, 1024, 768, 512, 384, 256, 128)


# ----------------------------------------------------------------------------
# Wrapper
# ----------------------------------------------------------------------------
@functools.partial(
    jax.jit, static_argnames=("tm", "tn", "tk", "compute_dtype", "out_dtype")
)
def lm_head(
    x,
    weight,
    bias,
    *,
    tm: int | None = None,
    tn: int | None = None,
    tk: int | None = None,
    compute_dtype=None,
    out_dtype=None,
):
    """x: (batch, seq, embed_dim); weight: (vocab, embed); bias: (vocab,).

    compute_dtype=None (default) keeps the given dtypes (no silent rounding):
    the big weight matrix is never cast per call. To stream the weight in
    bf16/int8, store it pre-cast and/or pass compute_dtype explicitly.
    """
    batch, seq, K = x.shape
    N, K_w = weight.shape
    assert K == K_w, (K, K_w)
    assert bias.shape == (N,), bias.shape
    M = batch * seq

    compute_dtype = jnp.dtype(weight.dtype if compute_dtype is None else compute_dtype)
    out_dtype = jnp.dtype(x.dtype if out_dtype is None else out_dtype)
    cbytes = compute_dtype.itemsize
    obytes = out_dtype.itemsize

    # Sublane multiple for the compute dtype (bf16 packs 16 rows per vreg).
    sub_m = {1: 32, 2: 16}.get(cbytes, 8)
    tm_cap = _round_up(M, sub_m)       # largest useful tm
    tn_cap = _round_up(N, 128)         # largest useful tn

    limit_cap = _vmem_limit_cap()
    budget = limit_cap * 7 // 8        # leave headroom for Mosaic scratch

    def full_k_bytes(tm_, tn_):
        # double-buffered x + weight tiles, double-buffered output, bias.
        return 2 * (tm_ + tn_) * K * cbytes + 2 * tm_ * tn_ * obytes + 2 * tn_ * 4

    # ---- explicit tile overrides (rounded / capped) -------------------------
    explicit_tm = None if tm is None else min(_round_up(tm, sub_m), tm_cap)
    explicit_tn = None if tn is None else min(_round_up(tn, 128), tn_cap)
    if tk is not None:
        tk = min(_round_up(tk, 128), _round_up(K, 128))

    # ---- path decision -------------------------------------------------------
    if tk is not None:
        full_k = tk >= K
    else:
        full_k = any(
            full_k_bytes(
                explicit_tm if explicit_tm is not None else min(t, tm_cap),
                explicit_tn if explicit_tn is not None else min(t, tn_cap),
            )
            <= budget
            for t in _SQUARE_TILE_TARGETS
        )

    if full_k:
        tk = K
        Kp = K
        tm_sel = tn_sel = None
        for t in _SQUARE_TILE_TARGETS:  # largest tile that fits the budget
            tm_c = explicit_tm if explicit_tm is not None else min(t, tm_cap)
            tn_c = explicit_tn if explicit_tn is not None else min(t, tn_cap)
            if full_k_bytes(tm_c, tn_c) <= budget:
                tm_sel, tn_sel = tm_c, tn_c
                break
        if tm_sel is None:  # explicit tk >= K forced full-K beyond the budget
            tm_sel = explicit_tm if explicit_tm is not None else min(128, tm_cap)
            tn_sel = explicit_tn if explicit_tn is not None else min(128, tn_cap)
        tm, tn = tm_sel, tn_sel
    else:
        tm = explicit_tm if explicit_tm is not None else min(512, tm_cap)
        tn = explicit_tn if explicit_tn is not None else min(1024, tn_cap)
        if tk is None:
            def reduce_bytes(tk_):
                return (
                    (2 * tm + 3 * tn) * tk_ * cbytes  # x (2 bufs) + weight (<=3 bufs)
                    + 2 * tm * tn * obytes
                    + tm * tn * 4                      # f32 accumulator scratch
                    + 2 * tn * 4
                )
            fitting = [t for t in _TK_TARGETS if reduce_bytes(t) <= budget] or [128]
            dividing = [t for t in fitting if K % t == 0]
            tk = dividing[0] if dividing else fitting[0]
        Kp = _round_up(K, tk)

    # ---- operand prep (no padding of M/N; ragged tiles handled by Pallas) ---
    x2d = x.reshape(M, K)
    if x2d.dtype != compute_dtype:
        x2d = x2d.astype(compute_dtype)          # cheap: M*K
    w = weight
    if w.dtype != compute_dtype:
        # Only happens when compute_dtype is explicitly different from the
        # stored weight dtype; for production, store the shared-embedding
        # weight pre-cast so this full-matrix copy never runs per step.
        w = w.astype(compute_dtype)
    b2d = bias.reshape(1, N).astype(jnp.float32)

    if not full_k and Kp != K:
        # Rare (embed dims are normally multiples of 128): zero-pad K so the
        # reduction never accumulates garbage.
        x2d = jnp.pad(x2d, ((0, 0), (0, Kp - K)))
        w = jnp.pad(w, ((0, 0), (0, Kp - K)))

    n_blocks = pl.cdiv(N, tn)
    m_blocks = pl.cdiv(M, tm)

    # ---- grid / specs --------------------------------------------------------
    if full_k:
        # Vocab axis OUTER: the weight block index depends only on it, so the
        # (vocab, embed) matrix is streamed from HBM exactly once per call.
        grid = (n_blocks, m_blocks)
        in_specs = [
            pl.BlockSpec((tm, K), lambda j, i: (i, 0)),   # x tile (re-streamed)
            pl.BlockSpec((tn, K), lambda j, i: (j, 0)),   # weight tile (outer only)
            pl.BlockSpec((1, tn), lambda j, i: (0, j)),   # bias tile
        ]
        out_spec = pl.BlockSpec((tm, tn), lambda j, i: (i, j))
        scratch = []
        kernel = _lmhead_full_k_kernel
        dim_sem = ("parallel", "parallel")
        k_steps = 1
        w_bufs = 2
        est_vmem = full_k_bytes(tm, tn)
    else:
        k_steps = Kp // tk
        grid = (n_blocks, m_blocks, k_steps)
        w_kwargs = {}
        if k_steps >= 3:
            # Deeper buffering on the streamed weight hides DMA latency when
            # the per-K-step MXU work is short.
            w_kwargs = dict(pipeline_mode=pl.Buffered(3))
        in_specs = [
            pl.BlockSpec((tm, tk), lambda j, i, k: (i, k)),            # x tile
            pl.BlockSpec((tn, tk), lambda j, i, k: (j, k), **w_kwargs),  # weight
            pl.BlockSpec((1, tn), lambda j, i, k: (0, j)),             # bias
        ]
        out_spec = pl.BlockSpec((tm, tn), lambda j, i, k: (i, j))
        scratch = [pltpu.VMEM((tm, tn), jnp.float32)]
        kernel = _lmhead_reduce_kernel
        dim_sem = ("parallel", "parallel", "arbitrary")
        w_bufs = 3 if k_steps >= 3 else 2
        est_vmem = (
            (2 * tm + w_bufs * tn) * tk * cbytes
            + 2 * tm * tn * obytes
            + tm * tn * 4
            + 2 * tn * 4
        )

    vmem_limit = int(
        min(max(est_vmem * 5 // 4, min(16 * 1024 * 1024, limit_cap)), limit_cap)
    )

    # Real streamed bytes for the chosen grid order.
    weight_passes = 1 if full_k else m_blocks
    cost = pl.CostEstimate(
        flops=2 * M * N * K,
        transcendentals=0,
        bytes_accessed=(
            weight_passes * N * Kp * cbytes      # weight streaming
            + n_blocks * M * Kp * cbytes         # x re-streamed per vocab block
            + M * N * obytes                     # output
            + N * 4                              # bias
        ),
    )

    out2d = pl.pallas_call(
        kernel,
        out_shape=jax.ShapeDtypeStruct((M, N), out_dtype),
        grid_spec=pltpu.PrefetchScalarGridSpec(
            num_scalar_prefetch=0,
            grid=grid,
            in_specs=in_specs,
            out_specs=out_spec,
            scratch_shapes=scratch,
        ),
        compiler_params=pltpu.CompilerParams(
            dimension_semantics=dim_sem,
            vmem_limit_bytes=vmem_limit,
        ),
        cost_estimate=cost,
    )(x2d, w, b2d)

    return out2d.reshape(batch, seq, N)


# ----------------------------------------------------------------------------
# Self-test
# ----------------------------------------------------------------------------
if __name__ == "__main__":
    # Small shapes consistent with the module's forward pass.
    batch, seq, embed_dim, vocab_size = 2, 8, 32, 256

    key = jax.random.PRNGKey(0)
    kx, kw = jax.random.split(key)

    x = jax.random.normal(kx, (batch, seq, embed_dim), dtype=jnp.float32)
    # "Shared embedding" weight, initialized deterministically in-script.
    weight = jax.random.normal(kw, (vocab_size, embed_dim), dtype=jnp.float32) * 0.02
    # Module initializes bias to zeros (kept as a real parameter in the kernel).
    bias = jnp.zeros((vocab_size,), dtype=jnp.float32)

    ref = jnp.einsum("bse,ve->bsv", x, weight) + bias

    # 1) Default path: dtypes preserved (f32 weight -> exact f32 compute),
    #    full-K single-shot tile, vocab-outer grid, no padding, no slicing.
    out_f32 = jax.block_until_ready(lm_head(x, weight, bias))
    assert out_f32.shape == (batch, seq, vocab_size)
    assert out_f32.dtype == x.dtype
    assert jnp.allclose(out_f32, ref, atol=1e-4, rtol=1e-4)

    # 2) Explicit bf16 streaming opt-in (f32 MXU accumulation), looser tolerance.
    out_bf16c = jax.block_until_ready(
        lm_head(x, weight, bias, compute_dtype=jnp.bfloat16)
    )
    assert out_bf16c.dtype == x.dtype
    assert jnp.allclose(out_bf16c, ref, atol=2e-2, rtol=2e-2)

    # 3) K-reduction fallback + ragged M/N tiles: M=15, N=200, tk=128 < K=256.
    b2, s2, e2, v2 = 3, 5, 256, 200
    k1, k2, k3 = (jax.random.PRNGKey(i) for i in (1, 2, 3))
    x2 = jax.random.normal(k1, (b2, s2, e2), dtype=jnp.float32)
    w2 = jax.random.normal(k2, (v2, e2), dtype=jnp.float32) * 0.05
    bias2 = jax.random.normal(k3, (v2,), dtype=jnp.float32) * 0.1
    ref2 = jnp.einsum("bse,ve->bsv", x2, w2) + bias2
    out2 = jax.block_until_ready(lm_head(x2, w2, bias2, tk=128))
    assert out2.shape == (b2, s2, v2)
    assert jnp.allclose(out2, ref2, atol=1e-3, rtol=1e-3)

    print("KERNEL_OK")
</pallas_src>

<mosaic_0001>
module attributes {stable_mosaic.version = 11 : i64} {
  func.func @_lmhead_full_k_kernel(%arg0: i32, %arg1: i32, %arg2: memref<16x32xf32, #tpu.memory_space<vmem>>, %arg3: memref<256x32xf32, #tpu.memory_space<vmem>>, %arg4: memref<1x256xf32, #tpu.memory_space<vmem>>, %arg5: memref<16x256xf32, #tpu.memory_space<vmem>>) attributes {dimension_semantics = [#tpu.dimension_semantics<parallel>, #tpu.dimension_semantics<parallel>], iteration_bounds = array<i64: 1, 1>, scalar_prefetch = 0 : i64, scratch_operands = 0 : i64, tpu.core_type = #tpu.core_type<tc>, window_params = [{transform_indices = @transform_0, window_bounds = array<i64: 16, 32>}, {transform_indices = @transform_1, window_bounds = array<i64: 256, 32>}, {transform_indices = @transform_2, window_bounds = array<i64: 1, 256>}, {transform_indices = @transform_3, window_bounds = array<i64: 16, 256>}]} {
    %c0 = arith.constant 0 : index
    %c0_0 = arith.constant 0 : index
    %0 = vector.load %arg2[%c0, %c0_0] : memref<16x32xf32, #tpu.memory_space<vmem>>, vector<16x32xf32>
    %c0_1 = arith.constant 0 : index
    %c0_2 = arith.constant 0 : index
    %1 = vector.load %arg3[%c0_1, %c0_2] : memref<256x32xf32, #tpu.memory_space<vmem>>, vector<256x32xf32>
    %cst = arith.constant dense<0.000000e+00> : vector<16x256xf32>
    %2 = tpu.matmul %0, %1, %cst {dimension_numbers = #tpu.dot_dimension_numbers<[1], [1], [0], [0], [0, 0, 1, 0], [], []>} : vector<16x32xf32>, vector<256x32xf32>, vector<16x256xf32> -> vector<16x256xf32>
    %c0_3 = arith.constant 0 : index
    %c0_4 = arith.constant 0 : index
    %3 = vector.load %arg4[%c0_3, %c0_4] : memref<1x256xf32, #tpu.memory_space<vmem>>, vector<1x256xf32>
    %4 = vector.broadcast %3 : vector<1x256xf32> to vector<16x256xf32>
    %5 = arith.addf %2, %4 : vector<16x256xf32>
    %c0_5 = arith.constant 0 : index
    %c0_6 = arith.constant 0 : index
    %6 = vector.load %arg5[%c0_5, %c0_6] : memref<16x256xf32, #tpu.memory_space<vmem>>, vector<16x256xf32>
    tpu.vector_store %arg5[%c0_5, %c0_6], %5 {strides = array<i32>} : memref<16x256xf32, #tpu.memory_space<vmem>>, vector<16x256xf32>,
    return
  }
  func.func @transform_0(%arg0: i32, %arg1: i32) -> (i32, i32) {
    %c0_i32 = arith.constant 0 : i32
    %c0_i32_0 = arith.constant 0 : i32
    return %arg1, %c0_i32 : i32, i32
  }
  func.func @transform_1(%arg0: i32, %arg1: i32) -> (i32, i32) {
    %c0_i32 = arith.constant 0 : i32
    %c0_i32_0 = arith.constant 0 : i32
    return %arg0, %c0_i32 : i32, i32
  }
  func.func @transform_2(%arg0: i32, %arg1: i32) -> (i32, i32) {
    %c0_i32 = arith.constant 0 : i32
    %c0_i32_0 = arith.constant 0 : i32
    return %c0_i32, %arg0 : i32, i32
  }
  func.func @transform_3(%arg0: i32, %arg1: i32) -> (i32, i32) {
    %c0_i32 = arith.constant 0 : i32
    return %arg1, %arg0 : i32, i32
  }
}

</mosaic_0001>

<bundles_post_ra>
// kernel: lm_head.1
= control target key start
LH: loop header
LB: loop body
LE: loop exit
PB: predicated region body
PF: predicated region fallthrough
CT: control target
= control target key end

     0   :  { %vm61_vm0 = vcmask 261120   ;;  %s595_s0 = inlined_call_operand.vmem [shape: f32[16,32], index: 0, kind: input, shape index: {}]   ;;  %s596_s1 = inlined_call_operand.vmem [shape: f32[256,32], index: 1, kind: input, shape index: {}]   ;;  %s597_s2 = inlined_call_operand.vmem [shape: f32[1,256], index: 2, kind: input, shape index: {}]   ;;  %s598_s3 = inlined_call_operand.hbm [shape: f32[16,256], index: 3, kind: output, shape index: {}]  }
   0x1   :  { %v48_v0 = vld [vmem:[%s596_s1 + $0xf8] sm:$0xff]  ;;  %v47_v2 = vld [vmem:[%s596_s1 + $0xf0] sm:$0xff]  ;;  %v46_v4 = vld [vmem:[%s596_s1 + $0xe8] sm:$0xff] }
   0x2   :  { %v32_v1 = vld [vmem:[%s596_s1 + $0x78] sm:$0xff]  ;;  %295 = vmatprep.subr.msk.mxu0 %vm61_vm0, %v48_v0  ;;  %331 = vmatprep.subr.msk.mxu1 %vm61_vm0, %v48_v0  ;;  %v31_v3 = vld [vmem:[%s596_s1 + $0x70] sm:$0xff]  ;;  %v30_v5 = vld [vmem:[%s596_s1 + $0x68] sm:$0xff] }
   0x3   :  { %296 = vmatpush3.xpose.msk.msra.mxu0 %vm61_vm0, %v32_v1  ;;  %347 = vmatpush3.xpose.msk.msra.mxu1 %vm61_vm0, %v32_v1  ;;  %v45_v6 = vld [vmem:[%s596_s1 + $0xe0] sm:$0xff]  ;;  %v457_v9 = vld [vmem:[%s595_s0 + $0x8] sm:$0xff] }
   0x4   :  { %297 = vmatprep.subr.msk.mxu0 %vm61_vm0, %v47_v2  ;;  %332 = vmatprep.subr.msk.mxu1 %vm61_vm0, %v47_v2  ;;  %v447_v7 = vld [vmem:[%s595_s0] sm:$0xff] }
   0x5   :  { %v29_v8 = vld [vmem:[%s596_s1 + $0x60] sm:$0xff] }
   0x7   :  { %298 = vmatpush3.xpose.msk.msra.mxu0 %vm61_vm0, %v31_v3  ;;  %348 = vmatpush3.xpose.msk.msra.mxu1 %vm61_vm0, %v31_v3 }
   0x8   :  { %299 = vmatprep.subr.msk.mxu0 %vm61_vm0, %v46_v4  ;;  %333 = vmatprep.subr.msk.mxu1 %vm61_vm0, %v46_v4 }
   0xb   :  { %300 = vmatpush3.xpose.msk.msra.mxu0 %vm61_vm0, %v30_v5  ;;  %349 = vmatpush3.xpose.msk.msra.mxu1 %vm61_vm0, %v30_v5 }
   0xc   :  { %301 = vmatprep.subr.msk.mxu0 %vm61_vm0, %v45_v6  ;;  %334 = vmatprep.subr.msk.mxu1 %vm61_vm0, %v45_v6 }
   0xd   :  { %8 = vsyncpa [#allocation3], 0  ;;  %v44_v10 = vld [vmem:[%s596_s1 + $0xd8] sm:$0xff]  ;;  %327 = vmatprep.mubr.msk.f32.mxu0 %vm61_vm0, %v447_v7  ;;  %329 = vmatprep.mubr.msk.f32.mxu1 %vm61_vm0, %v457_v9  ;;  %v43_v12 = vld [vmem:[%s596_s1 + $0xd0] sm:$0xff]  ;;  %v51_v34 = vlaneseq }
   0xe   :  { %v28_v11 = vld [vmem:[%s596_s1 + $0x58] sm:$0xff]  ;;  %v27_v13 = vld [vmem:[%s596_s1 + $0x50] sm:$0xff]  ;;  %v42_v14 = vld [vmem:[%s596_s1 + $0xc8] sm:$0xff] }
   0xf   :  { %302 = vmatpush3.xpose.msk.msra.mxu0 %vm61_vm0, %v29_v8  ;;  %350 = vmatpush3.xpose.msk.msra.mxu1 %vm61_vm0, %v29_v8  ;;  %v26_v15 = vld [vmem:[%s596_s1 + $0x48] sm:$0xff]  ;;  %v41_v16 = vld [vmem:[%s596_s1 + $0xc0] sm:$0xff]  ;;  %v40_v18 = vld [vmem:[%s596_s1 + $0xb8] sm:$0xff]  ;;  %v52_v35 = vshrl.u32 %v51_v34, 7 }
  0x10   :  { %303 = vmatprep.subr.msk.mxu0 %vm61_vm0, %v44_v10  ;;  %335 = vmatprep.subr.msk.mxu1 %vm61_vm0, %v44_v10  ;;  %v25_v17 = vld [vmem:[%s596_s1 + $0x40] sm:$0xff]  ;;  %v24_v19 = vld [vmem:[%s596_s1 + $0x38] sm:$0xff]  ;;  %v39_v20 = vld [vmem:[%s596_s1 + $0xb0] sm:$0xff] }
  0x11   :  { %v23_v21 = vld [vmem:[%s596_s1 + $0x30] sm:$0xff]  ;;  %v38_v22 = vld [vmem:[%s596_s1 + $0xa8] sm:$0xff]  ;;  %v37_v24 = vld [vmem:[%s596_s1 + $0xa0] sm:$0xff]  ;;  %v53_v36 = vsub.s32 0, %v52_v35  ;;  %v57_v38 = vsub.s32 1, %v52_v35 }
  0x12   :  { %v22_v23 = vld [vmem:[%s596_s1 + $0x28] sm:$0xff]  ;;  %v21_v25 = vld [vmem:[%s596_s1 + $0x20] sm:$0xff]  ;;  %v36_v26 = vld [vmem:[%s596_s1 + $0x98] sm:$0xff] }
  0x13   :  { %304 = vmatpush3.xpose.msk.msra.mxu0 %vm61_vm0, %v28_v11  ;;  %351 = vmatpush3.xpose.msk.msra.mxu1 %vm61_vm0, %v28_v11  ;;  %v20_v27 = vld [vmem:[%s596_s1 + $0x18] sm:$0xff]  ;;  %v35_v28 = vld [vmem:[%s596_s1 + $0x90] sm:$0xff]  ;;  %v34_v30 = vld [vmem:[%s596_s1 + $0x88] sm:$0xff] }
  0x14   :  { %305 = vmatprep.subr.msk.mxu0 %vm61_vm0, %v43_v12  ;;  %336 = vmatprep.subr.msk.mxu1 %vm61_vm0, %v43_v12  ;;  %v19_v29 = vld [vmem:[%s596_s1 + $0x10] sm:$0xff]  ;;  %v18_v31 = vld [vmem:[%s596_s1 + $0x8] sm:$0xff]  ;;  %v33_v32 = vld [vmem:[%s596_s1 + $0x80] sm:$0xff] }
  0x15   :  { %v17_v33 = vld [vmem:[%s596_s1] sm:$0xff]  ;;  %s388_s1 = smov [#allocation2]  }
  0x16   :  { %v49_v37 = vld [vmem:[%s597_s2] sm:$0x3]  ;;  %s250_s26 = sshll.u32 %s388_s1, 4  ;;  %s251_s26 = int_to_ptr.vmem [resolvable:$true] %s250_s26 }
  0x17   :  { %306 = vmatpush3.xpose.msk.msra.mxu0 %vm61_vm0, %v27_v13  ;;  %352 = vmatpush3.xpose.msk.msra.mxu1 %vm61_vm0, %v27_v13  ;;  %v54_v39 = vrot.slane %v49_v37, %v53_v36  ;;  %v58_v40 = vrot.slane %v49_v37, %v57_v38  ;;  %s366_s27 = scalar_lea.vmem %s251_s26, 512  ;;  %p371_p1 = scmp.lt.s32.totalorder %s251_s26, %s251_s26 }
  0x18   :  { %307 = vmatprep.subr.msk.mxu0 %vm61_vm0, %v42_v14  ;;  %337 = vmatprep.subr.msk.mxu1 %vm61_vm0, %v42_v14  ;;  %p367_p0 = scmp.ne.s32.totalorder %s251_s26, %s366_s27  ;;  %p372_p2 = scmp.lt.s32.totalorder %s366_s27, %s366_s27 }
  0x1a   :  { %p373_p3 = por %p372_p2, %p371_p1 }
  0x1b   :  { %308 = vmatpush3.xpose.msk.msra.mxu0 %vm61_vm0, %v26_v15  ;;  %353 = vmatpush3.xpose.msk.msra.mxu1 %vm61_vm0, %v26_v15 }
  0x1c   :  { %309 = vmatprep.subr.msk.mxu0 %vm61_vm0, %v41_v16  ;;  %338 = vmatprep.subr.msk.mxu1 %vm61_vm0, %v41_v16  ;;  %p374_p4 = pnand %p373_p3, %p367_p0 }
  0x1f   :  { %310 = vmatpush3.xpose.msk.msra.mxu0 %vm61_vm0, %v25_v17  ;;  %354 = vmatpush3.xpose.msk.msra.mxu1 %vm61_vm0, %v25_v17 }
  0x20   :  { %311 = vmatprep.subr.msk.mxu0 %vm61_vm0, %v40_v18  ;;  %339 = vmatprep.subr.msk.mxu1 %vm61_vm0, %v40_v18 }
  0x23   :  { %312 = vmatpush3.xpose.msk.msra.mxu0 %vm61_vm0, %v24_v19  ;;  %355 = vmatpush3.xpose.msk.msra.mxu1 %vm61_vm0, %v24_v19 }
  0x24   :  { %313 = vmatprep.subr.msk.mxu0 %vm61_vm0, %v39_v20  ;;  %340 = vmatprep.subr.msk.mxu1 %vm61_vm0, %v39_v20 }
  0x27   :  { %314 = vmatpush3.xpose.msk.msra.mxu0 %vm61_vm0, %v23_v21  ;;  %356 = vmatpush3.xpose.msk.msra.mxu1 %vm61_vm0, %v23_v21 }
  0x28   :  { %315 = vmatprep.subr.msk.mxu0 %vm61_vm0, %v38_v22  ;;  %341 = vmatprep.subr.msk.mxu1 %vm61_vm0, %v38_v22 }
  0x2b   :  { %316 = vmatpush3.xpose.msk.msra.mxu0 %vm61_vm0, %v22_v23  ;;  %357 = vmatpush3.xpose.msk.msra.mxu1 %vm61_vm0, %v22_v23 }
  0x2c   :  { %317 = vmatprep.subr.msk.mxu0 %vm61_vm0, %v37_v24  ;;  %342 = vmatprep.subr.msk.mxu1 %vm61_vm0, %v37_v24 }
  0x2f   :  { %318 = vmatpush3.xpose.msk.msra.mxu0 %vm61_vm0, %v21_v25  ;;  %358 = vmatpush3.xpose.msk.msra.mxu1 %vm61_vm0, %v21_v25 }
  0x30   :  { %319 = vmatprep.subr.msk.mxu0 %vm61_vm0, %v36_v26  ;;  %343 = vmatprep.subr.msk.mxu1 %vm61_vm0, %v36_v26 }
  0x33   :  { %320 = vmatpush3.xpose.msk.msra.mxu0 %vm61_vm0, %v20_v27  ;;  %359 = vmatpush3.xpose.msk.msra.mxu1 %vm61_vm0, %v20_v27 }
  0x34   :  { %321 = vmatprep.subr.msk.mxu0 %vm61_vm0, %v35_v28  ;;  %344 = vmatprep.subr.msk.mxu1 %vm61_vm0, %v35_v28 }
  0x37   :  { %322 = vmatpush3.xpose.msk.msra.mxu0 %vm61_vm0, %v19_v29  ;;  %360 = vmatpush3.xpose.msk.msra.mxu1 %vm61_vm0, %v19_v29 }
  0x38   :  { %323 = vmatprep.subr.msk.mxu0 %vm61_vm0, %v34_v30  ;;  %345 = vmatprep.subr.msk.mxu1 %vm61_vm0, %v34_v30 }
  0x3b   :  { %324 = vmatpush3.xpose.msk.msra.mxu0 %vm61_vm0, %v18_v31  ;;  %361 = vmatpush3.xpose.msk.msra.mxu1 %vm61_vm0, %v18_v31 }
  0x3c   :  { %325 = vmatprep.subr.msk.mxu0 %vm61_vm0, %v33_v32  ;;  %346 = vmatprep.subr.msk.mxu1 %vm61_vm0, %v33_v32 }
  0x3f   :  { %326 = vmatpush3.xpose.msk.msra.mxu0 %vm61_vm0, %v17_v33  ;;  %362 = vmatpush3.xpose.msk.msra.mxu1 %vm61_vm0, %v17_v33 }
  0x42   :  { %328 = vmatmul.mubr.msk.f32.vlgmr.msra.gmra.mxu0 %vm61_vm0, %v447_v7  ;;  %330 = vmatmul.mubr.msk.f32.vlgmr.msra.gmra.mxu1 %vm61_vm0, %v457_v9 }
 0x102   :  { %v230_v41 = vpop.f32.mrf.mxu0  ;;  %v236_v42 = vpop.f32.mrf.mxu1 }
 0x103   :  { %v231_v43 = vadd.f32 %v230_v41, %v54_v39  ;;  %v237_v44 = vadd.f32 %v236_v42, %v54_v39 }
 0x104   :  { %v232_v45 = vpop.f32.mrf.mxu0  ;;  %v238_v46 = vpop.f32.mrf.mxu1 }
 0x105   :  { %241 = vst [vmem:[#allocation2] sm:$0xff] %v231_v43  ;;  %243 = vst [vmem:[#allocation2 + $0x10] sm:$0xff] %v237_v44  ;;  %v233_v47 = vadd.f32 %v232_v45, %v58_v40  ;;  %v239_v48 = vadd.f32 %v238_v46, %v58_v40 }
 0x107   :  { %242 = vst [vmem:[#allocation2 + $0x8] sm:$0xff] %v233_v47  ;;  %244 = vst [vmem:[#allocation2 + $0x18] sm:$0xff] %v239_v48 }
 0x108   :  { %377 = shalt.err (!%p374_p4)
}
 0x109   :  { %s389_s2 = smov 256   ;;  %s390_s28 = smov 16  }
 0x10a   :  { %256 = dma.vmem_to_hbm [thread:$0]  %s251_s26, 512, %s598_s3, [#allocation3], %s389_s2, %s389_s2, %s390_s28  }
 0x10b   :  { %386 = dma.done.wait [#allocation3], 512  }
 0x10c   :  { %387 = vsyncadd [#allocation3], 4294966784 }
 0x10d   :  { %260 = vsyncpa [#allocation3], 1 }

</bundles_post_ra>
